<compile_context>
chip_gen: v7x
topology: tpu7x:2x2x1
jax: 0.10.0
libtpu: 0.0.40
codegen_flags: <defaults>
</compile_context>

<pallas_src>
import functools
import math

import jax
import jax.numpy as jnp
from jax.experimental import pallas as pl
from jax.experimental.pallas import tpu as pltpu


def gaussian_decoder_kernel(z_ref, w_ref, b_ref, x_ref,
                            mu_ref, nll_ref,
                            *, inv_scale, log_norm):
    # model(z): linear decoder tile on the MXU, f32 accumulate.
    mu = jnp.dot(z_ref[...], w_ref[...],
                 preferred_element_type=jnp.float32) + b_ref[...]
    mu_ref[...] = mu.astype(mu_ref.dtype)

    # -log N(x; mu, scale), elementwise on the VPU (constants baked in).
    diff = (x_ref[...].astype(jnp.float32) - mu) * inv_scale
    nll_ref[...] = (0.5 * diff * diff + log_norm).astype(nll_ref.dtype)


def _pick_tile_n(D):
    # Lane-dense tile: largest of {2048, 1024, 512, 256, 128} dividing D;
    # else the full D (a full-extent block is always legal).
    for tn in (2048, 1024, 512, 256, 128):
        if D % tn == 0:
            return tn
    return D


def _pick_tile_m(B):
    # Keep the whole (small) batch per tile; only split very large batches on
    # sublane-friendly multiples.
    if B > 128 and B % 128 == 0:
        return 128
    return B


def gaussian_decoder_forward(z, x_nchw, W, b, scale, *, weights_dtype=None):
    """z: (B, Z); x_nchw: (B, C, H, W); W: (Z, C*H*W); b: (C*H*W,); scale: float.

    weights_dtype: optionally jnp.bfloat16 to halve W/z HBM traffic (re-validate
    tolerances downstream if used).
    """
    B, C, H, Wd = x_nchw.shape
    D = C * H * Wd
    Z = z.shape[1]

    x_flat = x_nchw.reshape(B, D).astype(jnp.float32)
    b2d = b.reshape(1, D).astype(jnp.float32)
    if weights_dtype is not None:
        W = W.astype(weights_dtype)
        z = z.astype(weights_dtype)

    tn = _pick_tile_n(D)
    tm = _pick_tile_m(B)
    grid = (B // tm, D // tn)

    inv_scale = 1.0 / float(scale)
    log_norm = math.log(float(scale)) + 0.5 * math.log(2.0 * math.pi)

    kernel = functools.partial(gaussian_decoder_kernel,
                               inv_scale=inv_scale, log_norm=log_norm)

    mu_flat, nll_flat = pl.pallas_call(
        kernel,
        out_shape=(
            jax.ShapeDtypeStruct((B, D), jnp.float32),
            jax.ShapeDtypeStruct((B, D), jnp.float32),
        ),
        grid_spec=pltpu.PrefetchScalarGridSpec(
            num_scalar_prefetch=0,
            grid=grid,
            in_specs=[
                pl.BlockSpec((tm, Z), lambda i, j: (i, 0)),   # z: row block, full K
                pl.BlockSpec((Z, tn), lambda i, j: (0, j)),   # W: full K, col block
                pl.BlockSpec((1, tn), lambda i, j: (0, j)),   # b: col block
                pl.BlockSpec((tm, tn), lambda i, j: (i, j)),  # x: output-shaped tile
            ],
            out_specs=(
                pl.BlockSpec((tm, tn), lambda i, j: (i, j)),  # mu
                pl.BlockSpec((tm, tn), lambda i, j: (i, j)),  # nll
            ),
        ),
        compiler_params=pltpu.CompilerParams(
            # Both grid axes are independent -> megacore sharding.
            dimension_semantics=("parallel", "parallel"),
        ),
    )(z, W, b2d, x_flat)

    mu_x = mu_flat.reshape(B, C, H, Wd)
    neg_logpx_z = nll_flat.reshape(B, C, H, Wd)
    return mu_x, neg_logpx_z


if __name__ == "__main__":
    # Small deterministic shapes consistent with the module's forward.
    B, C, H, Wd = 2, 4, 16, 16      # x: (B, C, H, W)
    Z = 32                          # latent dim
    D = C * H * Wd                  # 1024 -> tn=1024, grid (1, 1)

    key = jax.random.PRNGKey(0)
    kz, kx, kw, kb = jax.random.split(key, 4)

    z = jax.random.normal(kz, (B, Z), dtype=jnp.float32)
    x = jax.random.normal(kx, (B, C, H, Wd), dtype=jnp.float32)
    # Deterministic parameter init for the linear decoder `model`.
    W = jax.random.normal(kw, (Z, D), dtype=jnp.float32) * 0.05
    b = jax.random.normal(kb, (D,), dtype=jnp.float32) * 0.01
    scale = 1.0

    mu_x, neg_logpx_z = gaussian_decoder_forward(z, x, W, b, scale)
    jax.block_until_ready((mu_x, neg_logpx_z))

    # Pure-JAX reference check of the Gaussian NLL semantics.
    mu_ref = (z @ W + b).reshape(B, C, H, Wd)
    nll_ref = (0.5 * ((x - mu_ref) / scale) ** 2
               + jnp.log(scale) + 0.5 * jnp.log(2.0 * jnp.pi))
    assert jnp.allclose(mu_x, mu_ref, atol=1e-5, rtol=1e-5)
    assert jnp.allclose(neg_logpx_z, nll_ref, atol=1e-5, rtol=1e-5)

    print("KERNEL_OK")
</pallas_src>

<mosaic_0001>
module attributes {stable_mosaic.version = 11 : i64} {
  func.func @gaussian_decoder_kernel(%arg0: i32, %arg1: i32, %arg2: memref<2x32xf32, #tpu.memory_space<vmem>>, %arg3: memref<32x1024xf32, #tpu.memory_space<vmem>>, %arg4: memref<1x1024xf32, #tpu.memory_space<vmem>>, %arg5: memref<2x1024xf32, #tpu.memory_space<vmem>>, %arg6: memref<2x1024xf32, #tpu.memory_space<vmem>>, %arg7: memref<2x1024xf32, #tpu.memory_space<vmem>>) attributes {dimension_semantics = [#tpu.dimension_semantics<parallel>, #tpu.dimension_semantics<parallel>], iteration_bounds = array<i64: 1, 1>, scalar_prefetch = 0 : i64, scratch_operands = 0 : i64, tpu.core_type = #tpu.core_type<tc>, window_params = [{transform_indices = @transform_0, window_bounds = array<i64: 2, 32>}, {transform_indices = @transform_1, window_bounds = array<i64: 32, 1024>}, {transform_indices = @transform_2, window_bounds = array<i64: 1, 1024>}, {transform_indices = @transform_3, window_bounds = array<i64: 2, 1024>}, {transform_indices = @transform_4, window_bounds = array<i64: 2, 1024>}, {transform_indices = @transform_5, window_bounds = array<i64: 2, 1024>}]} {
    %c0 = arith.constant 0 : index
    %c0_0 = arith.constant 0 : index
    %0 = vector.load %arg2[%c0, %c0_0] : memref<2x32xf32, #tpu.memory_space<vmem>>, vector<2x32xf32>
    %c0_1 = arith.constant 0 : index
    %c0_2 = arith.constant 0 : index
    %1 = vector.load %arg3[%c0_1, %c0_2] : memref<32x1024xf32, #tpu.memory_space<vmem>>, vector<32x1024xf32>
    %cst = arith.constant dense<0.000000e+00> : vector<2x1024xf32>
    %2 = tpu.matmul %0, %1, %cst {dimension_numbers = #tpu.dot_dimension_numbers<[1], [0], [0], [1], [0, 0, 1, 1], [], []>} : vector<2x32xf32>, vector<32x1024xf32>, vector<2x1024xf32> -> vector<2x1024xf32>
    %c0_3 = arith.constant 0 : index
    %c0_4 = arith.constant 0 : index
    %3 = vector.load %arg4[%c0_3, %c0_4] : memref<1x1024xf32, #tpu.memory_space<vmem>>, vector<1x1024xf32>
    %4 = vector.broadcast %3 : vector<1x1024xf32> to vector<2x1024xf32>
    %5 = arith.addf %2, %4 : vector<2x1024xf32>
    %c0_5 = arith.constant 0 : index
    %c0_6 = arith.constant 0 : index
    %6 = vector.load %arg6[%c0_5, %c0_6] : memref<2x1024xf32, #tpu.memory_space<vmem>>, vector<2x1024xf32>
    tpu.vector_store %arg6[%c0_5, %c0_6], %5 {strides = array<i32>} : memref<2x1024xf32, #tpu.memory_space<vmem>>, vector<2x1024xf32>,
    %c0_7 = arith.constant 0 : index
    %c0_8 = arith.constant 0 : index
    %7 = vector.load %arg5[%c0_7, %c0_8] : memref<2x1024xf32, #tpu.memory_space<vmem>>, vector<2x1024xf32>
    %8 = arith.subf %7, %5 : vector<2x1024xf32>
    %cst_9 = arith.constant 1.000000e+00 : f32
    %9 = vector.broadcast %cst_9 : f32 to vector<2x1024xf32>
    %10 = arith.mulf %8, %9 : vector<2x1024xf32>
    %cst_10 = arith.constant 5.000000e-01 : f32
    %11 = vector.broadcast %cst_10 : f32 to vector<2x1024xf32>
    %12 = arith.mulf %11, %10 : vector<2x1024xf32>
    %13 = arith.mulf %12, %10 : vector<2x1024xf32>
    %cst_11 = arith.constant 0.918938517 : f32
    %14 = vector.broadcast %cst_11 : f32 to vector<2x1024xf32>
    %15 = arith.addf %13, %14 : vector<2x1024xf32>
    %c0_12 = arith.constant 0 : index
    %c0_13 = arith.constant 0 : index
    %16 = vector.load %arg7[%c0_12, %c0_13] : memref<2x1024xf32, #tpu.memory_space<vmem>>, vector<2x1024xf32>
    tpu.vector_store %arg7[%c0_12, %c0_13], %15 {strides = array<i32>} : memref<2x1024xf32, #tpu.memory_space<vmem>>, vector<2x1024xf32>,
    return
  }
  func.func @transform_0(%arg0: i32, %arg1: i32) -> (i32, i32) {
    %c0_i32 = arith.constant 0 : i32
    %c0_i32_0 = arith.constant 0 : i32
    return %arg0, %c0_i32 : i32, i32
  }
  func.func @transform_1(%arg0: i32, %arg1: i32) -> (i32, i32) {
    %c0_i32 = arith.constant 0 : i32
    %c0_i32_0 = arith.constant 0 : i32
    return %c0_i32, %arg1 : i32, i32
  }
  func.func @transform_2(%arg0: i32, %arg1: i32) -> (i32, i32) {
    %c0_i32 = arith.constant 0 : i32
    %c0_i32_0 = arith.constant 0 : i32
    return %c0_i32, %arg1 : i32, i32
  }
  func.func @transform_3(%arg0: i32, %arg1: i32) -> (i32, i32) {
    %c0_i32 = arith.constant 0 : i32
    return %arg0, %arg1 : i32, i32
  }
  func.func @transform_4(%arg0: i32, %arg1: i32) -> (i32, i32) {
    %c0_i32 = arith.constant 0 : i32
    return %arg0, %arg1 : i32, i32
  }
  func.func @transform_5(%arg0: i32, %arg1: i32) -> (i32, i32) {
    %c0_i32 = arith.constant 0 : i32
    return %arg0, %arg1 : i32, i32
  }
}

</mosaic_0001>

<bundles_post_ra>
// kernel: tpu_custom_call.1
= control target key start
LH: loop header
LB: loop body
LE: loop exit
PB: predicated region body
PF: predicated region fallthrough
CT: control target
= control target key end

     0   :  { %11 = vsyncpa [#allocation3], 0  ;;  %s830_s0 = inlined_call_operand.hbm [shape: f32[2,32], index: 0, kind: input, shape index: {}]   ;;  %s831_s1 = inlined_call_operand.hbm [shape: f32[32,1024], index: 1, kind: input, shape index: {}]   ;;  %s832_s2 = inlined_call_operand.hbm [shape: f32[1,1024], index: 2, kind: input, shape index: {}]   ;;  %s833_s3 = inlined_call_operand.hbm [shape: f32[2,1024], index: 3, kind: input, shape index: {}]   ;;  %s834_s4 = inlined_call_operand.hbm [shape: f32[2,1024], index: 4, kind: output, shape index: {0}]   ;;  %s835_s5 = inlined_call_operand.hbm [shape: f32[2,1024], index: 5, kind: output, shape index: {1}]  }
   0x1   :  { %12 = vsyncpa [#allocation6], 0 }
   0x2   :  { %13 = vsyncpa [#allocation9], 0 }
   0x3   :  { %14 = vsyncpa [#allocation4], 0 }
   0x4   :  { %15 = vsyncpa [#allocation12], 0  ;;  %s710_s18 = smov [#allocation5]   ;;  %s568_s22 = scalar_lea.hbm %s831_s1, 4096 }
   0x5   :  { %s31_s19 = sshll.u32 %s710_s18, 4  ;;  %p569_p0 = scmp.ne.s32.totalorder %s831_s1, %s568_s22  ;;  %s32_s19 = int_to_ptr.vmem [resolvable:$true] %s31_s19 }
   0x6   :  { %p572_p1 = scmp.lt.u32.totalorder %s568_s22, %s831_s1 }
   0x8   :  { %p574_p2 = pnand %p572_p1, %p569_p0 }
   0xa   :  { %577 = shalt.err (!%p574_p2)
}
   0xb   :  { %s578_s27 = scalar_lea.vmem %s32_s19, 4096  ;;  %p583_p4 = scmp.lt.s32.totalorder %s32_s19, %s32_s19 }
   0xc   :  { %p579_p3 = scmp.ne.s32.totalorder %s32_s19, %s578_s27  ;;  %p584_p5 = scmp.lt.s32.totalorder %s578_s27, %s578_s27 }
   0xe   :  { %p585_p6 = por %p584_p5, %p583_p4 }
  0x10   :  { %p586_p7 = pnand %p585_p6, %p579_p3 }
  0x12   :  { %589 = shalt.err (!%p586_p7)
}
  0x13   :  { %s711_s28 = smov 1024   ;;  %s712_s29 = smov 64  }
  0x14   :  { %37 = dma.hbm_to_vmem [thread:$0]  %s831_s1, 4096, %s32_s19, [#allocation6], %s711_s28, %s711_s28, %s712_s29  }
  0x15   :  { %s713_s7 = smov [#allocation2]   ;;  %s714_s9 = smov [#allocation7]  }
  0x16   :  { %s22_s8 = sshll.u32 %s713_s7, 4  ;;  %s44_s10 = sshll.u32 %s714_s9, 4  ;;  %s23_s8 = int_to_ptr.vmem [resolvable:$true] %s22_s8  ;;  %s45_s10 = int_to_ptr.vmem [resolvable:$true] %s44_s10 }
  0x17   :  { %s590_s13 = scalar_lea.hbm %s830_s0, 32 }
  0x18   :  { %p591_p8 = scmp.ne.s32.totalorder %s830_s0, %s590_s13  ;;  %p594_p9 = scmp.lt.u32.totalorder %s590_s13, %s830_s0 }
  0x1a   :  { %p596_p10 = pnand %p594_p9, %p591_p8 }
  0x1c   :  { %599 = shalt.err (!%p596_p10)
}
  0x1d   :  { %s600_s1 = scalar_lea.vmem %s23_s8, 32  ;;  %p605_p12 = scmp.lt.s32.totalorder %s23_s8, %s23_s8 }
  0x1e   :  { %p601_p11 = scmp.ne.s32.totalorder %s23_s8, %s600_s1  ;;  %p606_p13 = scmp.lt.s32.totalorder %s600_s1, %s600_s1 }
  0x20   :  { %p607_p0 = por %p606_p13, %p605_p12 }
  0x22   :  { %p608_p1 = pnand %p607_p0, %p601_p11 }
  0x24   :  { %611 = shalt.err (!%p608_p1)
}
  0x25   :  { %25 = dma.hbm_to_vmem [thread:$0]  %s830_s0, 32, %s23_s8, [#allocation3]  }
  0x26   :  { %s612_s22 = scalar_lea.hbm %s832_s2, 128 }
  0x27   :  { %p613_p2 = scmp.ne.s32.totalorder %s832_s2, %s612_s22  ;;  %p616_p3 = scmp.lt.u32.totalorder %s612_s22, %s832_s2 }
  0x29   :  { %p618_p4 = pnand %p616_p3, %p613_p2 }
  0x2b   :  { %621 = shalt.err (!%p618_p4)
}
  0x2c   :  { %s622_s27 = scalar_lea.vmem %s45_s10, 128  ;;  %p627_p6 = scmp.lt.s32.totalorder %s45_s10, %s45_s10 }
  0x2d   :  { %p623_p5 = scmp.ne.s32.totalorder %s45_s10, %s622_s27  ;;  %p628_p7 = scmp.lt.s32.totalorder %s622_s27, %s622_s27 }
  0x2f   :  { %p629_p8 = por %p628_p7, %p627_p6 }
  0x31   :  { %p630_p9 = pnand %p629_p8, %p623_p5 }
  0x33   :  { %633 = shalt.err (!%p630_p9)
}
  0x34   :  { %47 = dma.hbm_to_vmem [thread:$0]  %s832_s2, 128, %s45_s10, [#allocation6]  }
  0x35   :  { %s715_s29 = smov [#allocation8]   ;;  %s634_s8 = scalar_lea.hbm %s833_s3, 256 }
  0x36   :  { %s54_s30 = sshll.u32 %s715_s29, 4  ;;  %p635_p10 = scmp.ne.s32.totalorder %s833_s3, %s634_s8  ;;  %s55_s30 = int_to_ptr.vmem [resolvable:$true] %s54_s30 }
  0x37   :  { %p638_p11 = scmp.lt.u32.totalorder %s634_s8, %s833_s3 }
  0x39   :  { %p640_p12 = pnand %p638_p11, %p635_p10 }
  0x3b   :  { %643 = shalt.err (!%p640_p12)
}
  0x3c   :  { %s644_s14 = scalar_lea.vmem %s55_s30, 256  ;;  %p649_p0 = scmp.lt.s32.totalorder %s55_s30, %s55_s30 }
  0x3d   :  { %p645_p13 = scmp.ne.s32.totalorder %s55_s30, %s644_s14  ;;  %p650_p1 = scmp.lt.s32.totalorder %s644_s14, %s644_s14 }
  0x3f   :  { %p651_p2 = por %p650_p1, %p649_p0 }
  0x41   :  { %p652_p3 = pnand %p651_p2, %p645_p13 }
  0x43   :  { %655 = shalt.err (!%p652_p3)
}
  0x44   :  { %57 = dma.hbm_to_vmem [thread:$0]  %s833_s3, 256, %s55_s30, [#allocation9]  }
  0x45   :  { %700 = dma.done.wait [#allocation3], 32  }
  0x46   :  { %701 = vsyncadd [#allocation3], 4294967264 }
  0x47   :  { %702 = dma.done.wait [#allocation6], 4224  }
  0x48   :  { %703 = vsyncadd [#allocation6], 4294963072 }
  0x49   :  { %704 = dma.done.wait [#allocation9], 256  }
  0x4a   :  { %705 = vsyncadd [#allocation9], 4294967040  ;;  %v716_v0 = vmov 0.0   ;;  %v72_v1 = vld [vmem:[#allocation5 + $0x8] sm:$0xff]  ;;  %v74_v3 = vld [vmem:[#allocation5 + $0x18] sm:$0xff]  ;;  %vm145_vm0 = vcmask 261120   ;;  %v105_v50 = vlaneseq }
  0x4b   :  { %213 = vmatprep.mubr.f32.mxu0 %v716_v0  ;;  %284 = vmatprep.mubr.f32.mxu1 %v716_v0  ;;  %v80_v2 = vld [vmem:[#allocation5 + $0x48] sm:$0xff]  ;;  %v82_v5 = vld [vmem:[#allocation5 + $0x58] sm:$0xff]  ;;  %v71_v6 = vld [vmem:[#allocation5] sm:$0xff]  ;;  %v717_v53 = vmov 1983009808   ;;  %s718_s3 = smov [#allocation10]  }
  0x4c   :  { %v526_v4 = vpack.c.bf16 %v80_v2, %v72_v1  ;;  %v79_v7 = vld [vmem:[#allocation5 + $0x40] sm:$0xff]  ;;  %v534_v8 = vpack.c.bf16 %v82_v5, %v74_v3  ;;  %v73_v10 = vld [vmem:[#allocation5 + $0x10] sm:$0xff]  ;;  %v88_v12 = vld [vmem:[#allocation5 + $0x88] sm:$0xff]  ;;  %v106_v51 = vshrl.u32 %v105_v50, 7  ;;  %v444_v54 = vunpack.c.l.s4 %v717_v53  ;;  %s497_s15 = sshll.u32 %s718_s3, 4  ;;  %s498_s15 = int_to_ptr.vmem [resolvable:$true] %s497_s15 }
  0x4d   :  { %v528_v9 = vpack.c.bf16 %v79_v7, %v71_v6  ;;  %v81_v11 = vld [vmem:[#allocation5 + $0x50] sm:$0xff]  ;;  %v96_v14 = vld [vmem:[#allocation5 + $0xc8] sm:$0xff]  ;;  %v90_v15 = vld [vmem:[#allocation5 + $0x98] sm:$0xff]  ;;  %s656_s16 = scalar_lea.vmem %s498_s15, 256  ;;  %p661_p5 = scmp.lt.s32.totalorder %s498_s15, %s498_s15 }
  0x4e   :  { %527 = vmatprep.subr.bf16.mxu0 %v526_v4  ;;  %v536_v13 = vpack.c.bf16 %v81_v11, %v73_v10  ;;  %v98_v16 = vld [vmem:[#allocation5 + $0xd8] sm:$0xff]  ;;  %535 = vmatprep.subr.bf16.mxu1 %v534_v8  ;;  %v530_v17 = vpack.c.bf16 %v96_v14, %v88_v12  ;;  %v87_v19 = vld [vmem:[#allocation5 + $0x80] sm:$0xff]  ;;  %v89_v21 = vld [vmem:[#allocation5 + $0x90] sm:$0xff]  ;;  %v107_v52 = vsub.s32 0, %v106_v51  ;;  %v115_v56 = vsub.s32 2, %v106_v51  ;;  %p657_p4 = scmp.ne.s32.totalorder %s498_s15, %s656_s16  ;;  %p662_p6 = scmp.lt.s32.totalorder %s656_s16, %s656_s16 }
  0x4f   :  { %529 = vmatpush1.bf16.msra.mxu0 %v528_v9  ;;  %v538_v18 = vpack.c.bf16 %v98_v16, %v90_v15  ;;  %v95_v20 = vld [vmem:[#allocation5 + $0xc0] sm:$0xff]  ;;  %v97_v23 = vld [vmem:[#allocation5 + $0xd0] sm:$0xff]  ;;  %v76_v24 = vld [vmem:[#allocation5 + $0x28] sm:$0xff]  ;;  %v111_v57 = vsub.s32 1, %v106_v51  ;;  %v119_v58 = vsub.s32 3, %v106_v51  ;;  %v445_v60 = vunpack.c.0.s8 %v444_v54 }
  0x50   :  { %537 = vmatpush1.bf16.msra.mxu1 %v536_v13  ;;  %v532_v22 = vpack.c.bf16 %v95_v20, %v87_v19  ;;  %531 = vmatprep.subr.bf16.mxu0 %v530_v17  ;;  %v540_v25 = vpack.c.bf16 %v97_v23, %v89_v21  ;;  %v70_v26 = vld [vmem:[#allocation2] sm:$0x3]  ;;  %v84_v27 = vld [vmem:[#allocation5 + $0x68] sm:$0xff]  ;;  %v75_v32 = vld [vmem:[#allocation5 + $0x20] sm:$0xff]  ;;  %v123_v5 = vsub.s32 4, %v106_v51  ;;  %v131_v9 = vsub.s32 6, %v106_v51  ;;  %p663_p7 = por %p662_p6, %p661_p5 }
  0x51   :  { %539 = vmatprep.subr.bf16.mxu1 %v538_v18  ;;  %v78_v28 = vld [vmem:[#allocation5 + $0x38] sm:$0xff]  ;;  %v542_v30 = vpack.c.bf16 %v84_v27, %v76_v24  ;;  %v83_v33 = vld [vmem:[#allocation5 + $0x60] sm:$0xff]  ;;  %v77_v34 = vld [vmem:[#allocation5 + $0x30] sm:$0xff]  ;;  %v448_v4 = vsub.s32 %v445_v60, %v106_v51  ;;  %v127_v10 = vsub.s32 5, %v106_v51  ;;  %v135_v12 = vsub.s32 7, %v106_v51 }
  0x52   :  { %v86_v29 = vld [vmem:[#allocation5 + $0x78] sm:$0xff]  ;;  %v544_v35 = vpack.c.bf16 %v83_v33, %v75_v32  ;;  %v85_v36 = vld [vmem:[#allocation5 + $0x70] sm:$0xff]  ;;  %v92_v37 = vld [vmem:[#allocation5 + $0xa8] sm:$0xff]  ;;  %p664_p8 = pnand %p663_p7, %p657_p4 }
  0x53   :  { %v550_v31 = vpack.c.bf16 %v86_v29, %v78_v28  ;;  %533 = vmatpush1.bf16.msra.mxu0 %v532_v22  ;;  %v100_v38 = vld [vmem:[#allocation5 + $0xe8] sm:$0xff]  ;;  %v552_v39 = vpack.c.bf16 %v85_v36, %v77_v34  ;;  %v94_v41 = vld [vmem:[#allocation5 + $0xb8] sm:$0xff]  ;;  %v91_v43 = vld [vmem:[#allocation5 + $0xa0] sm:$0xff] }
  0x54   :  { %541 = vmatpush1.bf16.msra.mxu1 %v540_v25  ;;  %543 = vmatprep.subr.bf16.mxu0 %v542_v30  ;;  %v546_v40 = vpack.c.bf16 %v100_v38, %v92_v37  ;;  %v102_v42 = vld [vmem:[#allocation5 + $0xf8] sm:$0xff]  ;;  %v99_v45 = vld [vmem:[#allocation5 + $0xe0] sm:$0xff]  ;;  %v93_v46 = vld [vmem:[#allocation5 + $0xb0] sm:$0xff] }
  0x55   :  { %551 = vmatprep.subr.bf16.mxu1 %v550_v31  ;;  %v554_v44 = vpack.c.bf16 %v102_v42, %v94_v41  ;;  %v101_v47 = vld [vmem:[#allocation5 + $0xf0] sm:$0xff]  ;;  %v548_v48 = vpack.c.bf16 %v99_v45, %v91_v43  ;;  %v103_v55 = vld [vmem:[#allocation7] sm:$0xff]  ;;  %v479_v22 = vld [vmem:[#allocation8] sm:$0xff] }
  0x56   :  { %522 = vmatmul.mubr.msk.f32.vlgmr.msra.gmra.mrb[0].mxu0 %vm145_vm0, %v70_v26  ;;  %v556_v49 = vpack.c.bf16 %v101_v47, %v93_v46  ;;  %v108_v59 = vrot.slane %v103_v55, %v107_v52  ;;  %v116_v61 = vrot.slane %v103_v55, %v115_v56  ;;  %v112_v62 = vrot.slane %v103_v55, %v111_v57  ;;  %v480_v38 = vld [vmem:[#allocation8 + $0x8] sm:$0xff] }
  0x57   :  { %523 = vmatmul.mubr.msk.f32.vlgmr.msra.gmra.mrb[0].mxu1 %vm145_vm0, %v70_v26  ;;  %545 = vmatpush1.bf16.msra.mxu0 %v544_v35  ;;  %v120_v63 = vrot.slane %v103_v55, %v119_v58  ;;  %v124_v15 = vrot.slane %v103_v55, %v123_v5  ;;  %v132_v17 = vrot.slane %v103_v55, %v131_v9 }
  0x58   :  { %553 = vmatpush1.bf16.msra.mxu1 %v552_v39  ;;  %547 = vmatprep.subr.bf16.mxu0 %v546_v40  ;;  %v128_v18 = vrot.slane %v103_v55, %v127_v10  ;;  %v136_v20 = vrot.slane %v103_v55, %v135_v12 }
  0x59   :  { %555 = vmatprep.subr.bf16.mxu1 %v554_v44  ;;  %355 = vmatprep.mubr.f32.mxu0 %v716_v0 }
  0x5a   :  { %426 = vmatprep.mubr.f32.mxu1 %v716_v0 }
  0x5b   :  { %549 = vmatpush1.bf16.msra.mxu0 %v548_v48 }
  0x5c   :  { %557 = vmatpush1.bf16.msra.mxu1 %v556_v49 }
  0x5e   :  { %524 = vmatmul.mubr.msk.f32.vlgmr.msra.gmra.mrb[2].mxu0 %vm145_vm0, %v70_v26 }
  0x5f   :  { %525 = vmatmul.mubr.msk.f32.vlgmr.msra.gmra.mrb[2].mxu1 %vm145_vm0, %v70_v26 }
 0x129   :  { %v215_v0 = vpop.f32.mrb[0].mxu0 }
 0x12a   :  { %v216_v1 = vadd.f32 %v215_v0, %v108_v59  ;;  %v286_v2 = vpop.f32.mrb[0].mxu1  ;;  %v217_v3 = vpop.f32.mrb[1].mxu0 }
 0x12b   :  { %v287_v6 = vadd.f32 %v286_v2, %v116_v61  ;;  %v218_v7 = vadd.f32 %v217_v3, %v112_v62  ;;  %v288_v8 = vpop.f32.mrb[1].mxu1 }
 0x12c   :  { %v289_v11 = vadd.f32 %v288_v8, %v120_v63 }
 0x12d   :  { %v441_v13 = vcombine.low %v216_v1, %v218_v7 }
 0x12e   :  { %v442_v14 = vcombine.low %v287_v6, %v289_v11 }
 0x12f   :  { %v449_v16 = vrot.slane %v441_v13, %v448_v4 }
 0x130   :  { %v456_v19 = vrot.slane %v442_v14, %v448_v4 }
 0x131   :  { %v357_v21 = vpop.f32.mrb[2].mxu0 }
 0x132   :  { %v358_v23 = vadd.f32 %v357_v21, %v124_v15  ;;  %v428_v24 = vpop.f32.mrb[2].mxu1  ;;  %v359_v25 = vpop.f32.mrb[3].mxu0  ;;  %v457_v26 = vcombine.low %v449_v16, %v456_v19 }
 0x133   :  { %v429_v27 = vadd.f32 %v428_v24, %v132_v17  ;;  %v360_v28 = vadd.f32 %v359_v25, %v128_v18  ;;  %v430_v29 = vpop.f32.mrb[3].mxu1 }
 0x134   :  { %v431_v30 = vadd.f32 %v430_v29, %v136_v20  ;;  %477 = vst [vmem:[#allocation10] sm:$0xff] %v457_v26  ;;  %v481_v31 = vsub.f32 %v479_v22, %v457_v26 }
 0x135   :  { %v458_v32 = vcombine.low %v358_v23, %v360_v28 }
 0x136   :  { %v459_v33 = vcombine.low %v429_v27, %v431_v30  ;;  %v483_v34 = vmul.f32 0.5, %v481_v31 }
 0x137   :  { %v466_v35 = vrot.slane %v458_v32, %v448_v4 }
 0x138   :  { %v473_v36 = vrot.slane %v459_v33, %v448_v4  ;;  %v485_v37 = vmul.f32 %v483_v34, %v481_v31 }
 0x13a   :  { %v474_v39 = vcombine.low %v466_v35, %v473_v36  ;;  %v487_v40 = vadd.f32 0.9189385, %v485_v37 }
 0x13c   :  { %478 = vst [vmem:[#allocation10 + $0x8] sm:$0xff] %v474_v39  ;;  %v482_v41 = vsub.f32 %v480_v38, %v474_v39  ;;  %489 = vst [vmem:[#allocation11] sm:$0xff] %v487_v40 }
 0x13d   :  { %667 = shalt.err (!%p664_p8)
}
 0x13e   :  { %s668_s18 = scalar_lea.hbm %s834_s4, 256 }
 0x13f   :  { %p669_p9 = scmp.ne.s32.totalorder %s834_s4, %s668_s18  ;;  %p672_p10 = scmp.lt.u32.totalorder %s668_s18, %s834_s4 }
 0x141   :  { %p674_p11 = pnand %p672_p10, %p669_p9 }
 0x143   :  { %677 = shalt.err (!%p674_p11)
}
 0x144   :  { %500 = dma.vmem_to_hbm [thread:$0]  %s498_s15, 256, %s834_s4, [#allocation4]   ;;  %v484_v42 = vmul.f32 0.5, %v482_v41 }
 0x145   :  { %s719_s25 = smov [#allocation11]  }
 0x146   :  { %s507_s26 = sshll.u32 %s719_s25, 4  ;;  %v486_v43 = vmul.f32 %v484_v42, %v482_v41  ;;  %s508_s26 = int_to_ptr.vmem [resolvable:$true] %s507_s26 }
 0x147   :  { %s678_s27 = scalar_lea.vmem %s508_s26, 256  ;;  %p683_p13 = scmp.lt.s32.totalorder %s508_s26, %s508_s26 }
 0x148   :  { %v488_v44 = vadd.f32 0.9189385, %v486_v43  ;;  %p679_p12 = scmp.ne.s32.totalorder %s508_s26, %s678_s27  ;;  %p684_p0 = scmp.lt.s32.totalorder %s678_s27, %s678_s27 }
 0x14a   :  { %490 = vst [vmem:[#allocation11 + $0x8] sm:$0xff] %v488_v44  ;;  %p685_p1 = por %p684_p0, %p683_p13 }
 0x14c   :  { %p686_p2 = pnand %p685_p1, %p679_p12 }
 0x14e   :  { %689 = shalt.err (!%p686_p2)
}
 0x14f   :  { %s690_s29 = scalar_lea.hbm %s835_s5, 256 }
 0x150   :  { %p691_p3 = scmp.ne.s32.totalorder %s835_s5, %s690_s29  ;;  %p694_p4 = scmp.lt.u32.totalorder %s690_s29, %s835_s5 }
 0x152   :  { %p696_p5 = pnand %p694_p4, %p691_p3 }
 0x154   :  { %699 = shalt.err (!%p696_p5)
}
 0x155   :  { %510 = dma.vmem_to_hbm [thread:$0]  %s508_s26, 256, %s835_s5, [#allocation12]  }
 0x156   :  { %706 = dma.done.wait [#allocation4], 256  }
 0x157   :  { %707 = vsyncadd [#allocation4], 4294967040 }
 0x158   :  { %708 = dma.done.wait [#allocation12], 256  }
 0x159   :  { %709 = vsyncadd [#allocation12], 4294967040 }
 0x15a   :  { %517 = vsyncpa [#allocation3], 1 }
 0x15b   :  { %518 = vsyncpa [#allocation6], 1 }
 0x15c   :  { %519 = vsyncpa [#allocation9], 1 }
 0x15d   :  { %520 = vsyncpa [#allocation4], 1 }
 0x15e   :  { %521 = vsyncpa [#allocation12], 1 }

</bundles_post_ra>
